<compile_context>
chip_gen: v7x
topology: tpu7x:2x2x1
jax: 0.10.0
libtpu: 0.0.40
codegen_flags: <defaults>
</compile_context>

<pallas_src>
import functools

import jax
import jax.numpy as jnp
from jax.experimental import pallas as pl
from jax.experimental.pallas import tpu as pltpu

LANE = 128  # pad target for the hidden (MXU) dims


def _round_up(x, m):
    return (x + m - 1) // m * m


# ----------------------------------------------------------------------------- kernel
def actor_kernel(state_ref, w1_ref, b1_ref, w2_ref, b2_ref, w3_ref, b3_ref,
                 cr_ref, out_ref):
    # f32 state tile -> bf16 for the MXU (cast in-kernel: no extra HBM pass).
    x = state_ref[...].astype(jnp.bfloat16)                      # (tb, S)
    # fc1 + relu  (bf16 MXU inputs, f32 accumulate, f32 elementwise)
    h1 = jnp.dot(x, w1_ref[...], preferred_element_type=jnp.float32) + b1_ref[...]
    h1 = jnp.maximum(h1, 0.0)
    # fc2 + relu
    h2 = jnp.dot(h1.astype(jnp.bfloat16), w2_ref[...],
                 preferred_element_type=jnp.float32) + b2_ref[...]
    h2 = jnp.maximum(h2, 0.0)
    # fc3 + tanh + ctrl_range scale  (narrow N = action_dim output)
    y = jnp.dot(h2.astype(jnp.bfloat16), w3_ref[...],
                preferred_element_type=jnp.float32) + b3_ref[...]
    y = jnp.tanh(y)
    out_ref[...] = (cr_ref[...] * y).astype(out_ref.dtype)


# ----------------------------------------------------------------------------- tiling
def _choose_batch_tile(batch, tile_b):
    """Balanced batch tiles (multiple of 8) -> no B_pad overshoot; >=2 grid steps when
    the batch allows it so v7x's second TensorCore gets work.  A single tile uses the
    full batch dim (always a legal block shape, even if batch < 8)."""
    n_tiles = pl.cdiv(batch, tile_b)
    if batch >= 16:
        n_tiles = max(n_tiles, 2)
    if n_tiles == 1:
        return batch
    return _round_up(pl.cdiv(batch, n_tiles), 8)


# ----------------------------------------------------------------------------- wrapper
@functools.partial(jax.jit, static_argnames=("tile_b",))
def actor_forward(state, kparams, *, tile_b=512):
    """state: (B, state_dim) float32.  kparams: output of prepare_actor_kernel_params."""
    B, state_dim = state.shape
    w1, b1 = kparams["w1"], kparams["b1"]
    w2, b2 = kparams["w2"], kparams["b2"]
    w3, b3 = kparams["w3"], kparams["b3"]
    cr = kparams["ctrl_range"]
    H1, H2, A = w1.shape[1], w2.shape[1], w3.shape[1]   # static ints (array shapes)

    tb = _choose_batch_tile(B, tile_b)
    grid = (pl.cdiv(B, tb),)                            # ragged last tile handled by Pallas
    resident = lambda i: (0, 0)                         # fetched once, reused every step

    # Advisory cost for XLA's scheduler.
    mm_flops = 2 * B * (state_dim * H1 + H1 * H2 + H2 * A)
    w_bytes = (state_dim * H1 + H1 * H2 + H2 * A) * 2 + (H1 + H2 + 2 * A) * 4
    cost = pl.CostEstimate(flops=mm_flops, transcendentals=B * A,
                           bytes_accessed=B * state_dim * 4 + w_bytes + B * A * 4)

    # VMEM budget: double-buffered streamed tiles + (double-buffered) resident params
    # + f32 intermediates, with headroom; clamped so it fits v7x's 64 MiB physical VMEM.
    vmem_est = (2 * (tb * state_dim * 4 + tb * A * 4)    # streamed state/out tiles
                + 2 * w_bytes                            # resident weights/biases
                + 2 * tb * (H1 + H2) * 4)                # h1/h2 temporaries (f32)
    vmem_limit = int(min(max(2 * vmem_est, 32 << 20), 48 << 20))

    out = pl.pallas_call(
        actor_kernel,
        out_shape=jax.ShapeDtypeStruct((B, A), jnp.float32),
        grid=grid,
        in_specs=[
            pl.BlockSpec((tb, state_dim), lambda i: (i, 0)),   # streamed raw f32 state
            pl.BlockSpec((state_dim, H1), resident),           # w1 (bf16)
            pl.BlockSpec((1, H1), resident),                   # b1
            pl.BlockSpec((H1, H2), resident),                  # w2 (bf16)
            pl.BlockSpec((1, H2), resident),                   # b2
            pl.BlockSpec((H2, A), resident),                   # w3 (bf16)
            pl.BlockSpec((1, A), resident),                    # b3
            pl.BlockSpec((1, A), resident),                    # ctrl_range
        ],
        out_specs=pl.BlockSpec((tb, A), lambda i: (i, 0)),     # narrow (B, action_dim)
        compiler_params=pltpu.CompilerParams(
            dimension_semantics=("parallel",),                  # megacore-shardable
            vmem_limit_bytes=vmem_limit),
        cost_estimate=cost,
    )(state, w1, b1, w2, b2, w3, b3, cr)
    return out


# ----------------------------------------------------------------------------- params
def init_actor_params(key, state_dim, action_dim, hidden_size1, hidden_size2,
                      ctrl_range):
    """Unpadded f32 master params matching the PyTorch module (W stored as (in, out))."""
    ks = jax.random.split(key, 6)

    def linear(kw, kb, fan_in, fan_out):
        # PyTorch nn.Linear default init: U(-1/sqrt(fan_in), 1/sqrt(fan_in))
        bound = 1.0 / jnp.sqrt(jnp.float32(fan_in))
        w = jax.random.uniform(kw, (fan_in, fan_out), jnp.float32, -bound, bound)
        b = jax.random.uniform(kb, (1, fan_out), jnp.float32, -bound, bound)
        return w, b

    w1, b1 = linear(ks[0], ks[1], state_dim, hidden_size1)
    w2, b2 = linear(ks[2], ks[3], hidden_size1, hidden_size2)
    w3, b3 = linear(ks[4], ks[5], hidden_size2, action_dim)
    cr = jnp.asarray(ctrl_range, jnp.float32).reshape(1, action_dim)
    return dict(w1=w1, b1=b1, w2=w2, b2=b2, w3=w3, b3=b3, ctrl_range=cr)


def prepare_actor_kernel_params(params, lane=LANE):
    """One-time (outside the hot path) zero-padding of the HIDDEN dims to multiples of
    `lane`, bf16 cast of the matmul weights.  state_dim and action_dim stay unpadded so
    the state streams raw and the output writeback is narrow.  Zero-padded hidden lanes
    stay exactly 0 through relu, so the math is unchanged."""
    state_dim, h1 = params["w1"].shape
    _, h2 = params["w2"].shape
    _, action_dim = params["w3"].shape
    H1, H2 = _round_up(h1, lane), _round_up(h2, lane)

    def pad2(a, rows, cols):
        return jnp.pad(a, ((0, rows - a.shape[0]), (0, cols - a.shape[1])))

    return dict(
        w1=pad2(params["w1"], state_dim, H1).astype(jnp.bfloat16),
        b1=pad2(params["b1"], 1, H1),
        w2=pad2(params["w2"], H1, H2).astype(jnp.bfloat16),
        b2=pad2(params["b2"], 1, H2),
        w3=pad2(params["w3"], H2, action_dim).astype(jnp.bfloat16),
        b3=params["b3"],
        ctrl_range=params["ctrl_range"],
    )


# ----------------------------------------------------------------------------- refs
def actor_reference_f32(state, p):
    """Pure-JAX f32 reference mirroring the PyTorch forward."""
    x = jnp.maximum(state @ p["w1"] + p["b1"], 0.0)
    x = jnp.maximum(x @ p["w2"] + p["b2"], 0.0)
    x = jnp.tanh(x @ p["w3"] + p["b3"])
    return p["ctrl_range"] * x


def actor_reference_bf16(state, p):
    """Pure-JAX reference using the same bf16-input / f32-accumulate matmul recipe."""
    def mm(a, w):
        return jnp.dot(a.astype(jnp.bfloat16), w.astype(jnp.bfloat16),
                       preferred_element_type=jnp.float32)
    x = jnp.maximum(mm(state, p["w1"]) + p["b1"], 0.0)
    x = jnp.maximum(mm(x, p["w2"]) + p["b2"], 0.0)
    x = jnp.tanh(mm(x, p["w3"]) + p["b3"])
    return p["ctrl_range"] * x


if __name__ == "__main__":
    # Small shapes consistent with the module's forward.
    batch = 4
    state_dim = 8
    action_dim = 4
    hidden_size1 = 32
    hidden_size2 = 32
    ctrl_range = [1.0, 2.0, 0.5, 1.5]   # per-action control range

    key = jax.random.PRNGKey(0)
    k_params, k_state, k_state2 = jax.random.split(key, 3)
    params = init_actor_params(k_params, state_dim, action_dim,
                               hidden_size1, hidden_size2, ctrl_range)
    kparams = prepare_actor_kernel_params(params)          # one-time pad/cast
    state = jax.random.normal(k_state, (batch, state_dim), jnp.float32)

    out = actor_forward(state, kparams)
    out = jax.block_until_ready(out)
    assert out.shape == (batch, action_dim)

    # tight check vs a reference using the same bf16-input matmul recipe
    ref_bf16 = actor_reference_bf16(state, params)
    assert jnp.allclose(out, ref_bf16, atol=2e-3, rtol=2e-3), "mismatch vs bf16 reference"

    # sanity check vs the full-f32 PyTorch-equivalent forward (bf16 input tolerance)
    ref_f32 = actor_reference_f32(state, params)
    assert jnp.allclose(out, ref_f32, atol=1e-1, rtol=1e-1), "mismatch vs f32 reference"

    # second run exercising the multi-tile / ragged-last-tile path (grid > 1)
    batch2 = 40
    state2 = jax.random.normal(k_state2, (batch2, state_dim), jnp.float32)
    out2 = jax.block_until_ready(actor_forward(state2, kparams))
    assert out2.shape == (batch2, action_dim)
    ref2 = actor_reference_bf16(state2, params)
    assert jnp.allclose(out2, ref2, atol=2e-3, rtol=2e-3), "mismatch on multi-tile batch"

    print("KERNEL_OK")
</pallas_src>

<mosaic_0001>
module attributes {stable_mosaic.version = 11 : i64} {
  func.func @actor_kernel(%arg0: i32, %arg1: memref<4x8xf32, #tpu.memory_space<vmem>>, %arg2: memref<8x128xbf16, #tpu.memory_space<vmem>>, %arg3: memref<1x128xf32, #tpu.memory_space<vmem>>, %arg4: memref<128x128xbf16, #tpu.memory_space<vmem>>, %arg5: memref<1x128xf32, #tpu.memory_space<vmem>>, %arg6: memref<128x4xbf16, #tpu.memory_space<vmem>>, %arg7: memref<1x4xf32, #tpu.memory_space<vmem>>, %arg8: memref<1x4xf32, #tpu.memory_space<vmem>>, %arg9: memref<4x4xf32, #tpu.memory_space<vmem>>) attributes {dimension_semantics = [#tpu.dimension_semantics<parallel>], iteration_bounds = array<i64: 1>, scalar_prefetch = 0 : i64, scratch_operands = 0 : i64, tpu.core_type = #tpu.core_type<tc>, window_params = [{transform_indices = @transform_0, window_bounds = array<i64: 4, 8>}, {pipeline_mode = #tpu.pipeline_mode<synchronous>, transform_indices = @transform_1, window_bounds = array<i64: 8, 128>}, {pipeline_mode = #tpu.pipeline_mode<synchronous>, transform_indices = @transform_2, window_bounds = array<i64: 1, 128>}, {pipeline_mode = #tpu.pipeline_mode<synchronous>, transform_indices = @transform_3, window_bounds = array<i64: 128, 128>}, {pipeline_mode = #tpu.pipeline_mode<synchronous>, transform_indices = @transform_4, window_bounds = array<i64: 1, 128>}, {pipeline_mode = #tpu.pipeline_mode<synchronous>, transform_indices = @transform_5, window_bounds = array<i64: 128, 4>}, {pipeline_mode = #tpu.pipeline_mode<synchronous>, transform_indices = @transform_6, window_bounds = array<i64: 1, 4>}, {pipeline_mode = #tpu.pipeline_mode<synchronous>, transform_indices = @transform_7, window_bounds = array<i64: 1, 4>}, {transform_indices = @transform_8, window_bounds = array<i64: 4, 4>}]} {
    %c0 = arith.constant 0 : index
    %c0_0 = arith.constant 0 : index
    %0 = vector.load %arg1[%c0, %c0_0] : memref<4x8xf32, #tpu.memory_space<vmem>>, vector<4x8xf32>
    %1 = arith.truncf %0 : vector<4x8xf32> to vector<4x8xbf16>
    %c0_1 = arith.constant 0 : index
    %c0_2 = arith.constant 0 : index
    %2 = vector.load %arg2[%c0_1, %c0_2] : memref<8x128xbf16, #tpu.memory_space<vmem>>, vector<8x128xbf16>
    %cst = arith.constant dense<0.000000e+00> : vector<4x128xf32>
    %3 = tpu.matmul %1, %2, %cst {dimension_numbers = #tpu.dot_dimension_numbers<[1], [0], [0], [1], [0, 0, 1, 1], [], []>} : vector<4x8xbf16>, vector<8x128xbf16>, vector<4x128xf32> -> vector<4x128xf32>
    %c0_3 = arith.constant 0 : index
    %c0_4 = arith.constant 0 : index
    %4 = vector.load %arg3[%c0_3, %c0_4] : memref<1x128xf32, #tpu.memory_space<vmem>>, vector<1x128xf32>
    %5 = vector.broadcast %4 : vector<1x128xf32> to vector<4x128xf32>
    %6 = arith.addf %3, %5 : vector<4x128xf32>
    %cst_5 = arith.constant 0.000000e+00 : f32
    %7 = vector.broadcast %cst_5 : f32 to vector<4x128xf32>
    %8 = arith.maximumf %6, %7 : vector<4x128xf32>
    %9 = arith.truncf %8 : vector<4x128xf32> to vector<4x128xbf16>
    %c0_6 = arith.constant 0 : index
    %c0_7 = arith.constant 0 : index
    %10 = vector.load %arg4[%c0_6, %c0_7] : memref<128x128xbf16, #tpu.memory_space<vmem>>, vector<128x128xbf16>
    %cst_8 = arith.constant dense<0.000000e+00> : vector<4x128xf32>
    %11 = tpu.matmul %9, %10, %cst_8 {dimension_numbers = #tpu.dot_dimension_numbers<[1], [0], [0], [1], [0, 0, 1, 1], [], []>} : vector<4x128xbf16>, vector<128x128xbf16>, vector<4x128xf32> -> vector<4x128xf32>
    %c0_9 = arith.constant 0 : index
    %c0_10 = arith.constant 0 : index
    %12 = vector.load %arg5[%c0_9, %c0_10] : memref<1x128xf32, #tpu.memory_space<vmem>>, vector<1x128xf32>
    %13 = vector.broadcast %12 : vector<1x128xf32> to vector<4x128xf32>
    %14 = arith.addf %11, %13 : vector<4x128xf32>
    %cst_11 = arith.constant 0.000000e+00 : f32
    %15 = vector.broadcast %cst_11 : f32 to vector<4x128xf32>
    %16 = arith.maximumf %14, %15 : vector<4x128xf32>
    %17 = arith.truncf %16 : vector<4x128xf32> to vector<4x128xbf16>
    %c0_12 = arith.constant 0 : index
    %c0_13 = arith.constant 0 : index
    %18 = vector.load %arg6[%c0_12, %c0_13] : memref<128x4xbf16, #tpu.memory_space<vmem>>, vector<128x4xbf16>
    %cst_14 = arith.constant dense<0.000000e+00> : vector<4x4xf32>
    %19 = tpu.matmul %17, %18, %cst_14 {dimension_numbers = #tpu.dot_dimension_numbers<[1], [0], [0], [1], [0, 0, 1, 1], [], []>} : vector<4x128xbf16>, vector<128x4xbf16>, vector<4x4xf32> -> vector<4x4xf32>
    %c0_15 = arith.constant 0 : index
    %c0_16 = arith.constant 0 : index
    %20 = vector.load %arg7[%c0_15, %c0_16] : memref<1x4xf32, #tpu.memory_space<vmem>>, vector<1x4xf32>
    %21 = vector.broadcast %20 : vector<1x4xf32> to vector<4x4xf32>
    %22 = arith.addf %19, %21 : vector<4x4xf32>
    %23 = math.tanh %22 : vector<4x4xf32>
    %c0_17 = arith.constant 0 : index
    %c0_18 = arith.constant 0 : index
    %24 = vector.load %arg8[%c0_17, %c0_18] : memref<1x4xf32, #tpu.memory_space<vmem>>, vector<1x4xf32>
    %25 = vector.broadcast %24 : vector<1x4xf32> to vector<4x4xf32>
    %26 = arith.mulf %25, %23 : vector<4x4xf32>
    %c0_19 = arith.constant 0 : index
    %c0_20 = arith.constant 0 : index
    %27 = vector.load %arg9[%c0_19, %c0_20] : memref<4x4xf32, #tpu.memory_space<vmem>>, vector<4x4xf32>
    tpu.vector_store %arg9[%c0_19, %c0_20], %26 {strides = array<i32>} : memref<4x4xf32, #tpu.memory_space<vmem>>, vector<4x4xf32>,
    return
  }
  func.func @transform_0(%arg0: i32) -> (i32, i32) {
    %c0_i32 = arith.constant 0 : i32
    %c0_i32_0 = arith.constant 0 : i32
    return %arg0, %c0_i32 : i32, i32
  }
  func.func @transform_1(%arg0: i32) -> (i32, i32) {
    %c0_i32 = arith.constant 0 : i32
    %c0_i32_0 = arith.constant 0 : i32
    %c0_i32_1 = arith.constant 0 : i32
    return %c0_i32, %c0_i32_0 : i32, i32
  }
  func.func @transform_2(%arg0: i32) -> (i32, i32) {
    %c0_i32 = arith.constant 0 : i32
    %c0_i32_0 = arith.constant 0 : i32
    %c0_i32_1 = arith.constant 0 : i32
    return %c0_i32, %c0_i32_0 : i32, i32
  }
  func.func @transform_3(%arg0: i32) -> (i32, i32) {
    %c0_i32 = arith.constant 0 : i32
    %c0_i32_0 = arith.constant 0 : i32
    %c0_i32_1 = arith.constant 0 : i32
    return %c0_i32, %c0_i32_0 : i32, i32
  }
  func.func @transform_4(%arg0: i32) -> (i32, i32) {
    %c0_i32 = arith.constant 0 : i32
    %c0_i32_0 = arith.constant 0 : i32
    %c0_i32_1 = arith.constant 0 : i32
    return %c0_i32, %c0_i32_0 : i32, i32
  }
  func.func @transform_5(%arg0: i32) -> (i32, i32) {
    %c0_i32 = arith.constant 0 : i32
    %c0_i32_0 = arith.constant 0 : i32
    %c0_i32_1 = arith.constant 0 : i32
    return %c0_i32, %c0_i32_0 : i32, i32
  }
  func.func @transform_6(%arg0: i32) -> (i32, i32) {
    %c0_i32 = arith.constant 0 : i32
    %c0_i32_0 = arith.constant 0 : i32
    %c0_i32_1 = arith.constant 0 : i32
    return %c0_i32, %c0_i32_0 : i32, i32
  }
  func.func @transform_7(%arg0: i32) -> (i32, i32) {
    %c0_i32 = arith.constant 0 : i32
    %c0_i32_0 = arith.constant 0 : i32
    %c0_i32_1 = arith.constant 0 : i32
    return %c0_i32, %c0_i32_0 : i32, i32
  }
  func.func @transform_8(%arg0: i32) -> (i32, i32) {
    %c0_i32 = arith.constant 0 : i32
    %c0_i32_0 = arith.constant 0 : i32
    return %arg0, %c0_i32 : i32, i32
  }
}

</mosaic_0001>

<bundles_post_ra>
// kernel: actor_forward.1
= control target key start
LH: loop header
LB: loop body
LE: loop exit
PB: predicated region body
PF: predicated region fallthrough
CT: control target
= control target key end

     0   :  { %vm45_vm0 = vcmask 1043456   ;;  %vm41_vm1 = vcmask 64512   ;;  %v472_v1 = vmov 0.0   ;;  %vm473_vm2 = vmmov 0   ;;  %s619_s0 = inlined_call_operand.vmem [shape: f32[4,8], index: 0, kind: input, shape index: {}]   ;;  %s620_s1 = inlined_call_operand.vmem [shape: bf16[8,128], index: 1, kind: input, shape index: {}]   ;;  %s621_s2 = inlined_call_operand.vmem [shape: f32[1,128], index: 2, kind: input, shape index: {}]   ;;  %s622_s3 = inlined_call_operand.vmem [shape: bf16[128,128], index: 3, kind: input, shape index: {}]   ;;  %s623_s4 = inlined_call_operand.vmem [shape: f32[1,128], index: 4, kind: input, shape index: {}]   ;;  %s624_s5 = inlined_call_operand.vmem [shape: bf16[128,4], index: 5, kind: input, shape index: {}]   ;;  %s625_s6 = inlined_call_operand.vmem [shape: f32[1,4], index: 6, kind: input, shape index: {}]   ;;  %s626_s7 = inlined_call_operand.vmem [shape: f32[1,4], index: 7, kind: input, shape index: {}]   ;;  %s627_s8 = inlined_call_operand.hbm [shape: f32[4,4], index: 8, kind: output, shape index: {}]  }
   0x1   :  { %v33_v0 = vld [vmem:[%s620_s1] sm:$0xf]  ;;  %381 = vmatprep.subr.bf16.mxu0 %v472_v1  ;;  %383 = vmatprep.mubr.msk.bf16.mxu0 %vm473_vm2, %v472_v1  ;;  %v431_v6 = vld [vmem:[%s622_s3 + $0x8] sm:$0xff]   ;;  %v432_v7 = vld [vmem:[%s622_s3 + $0x10] sm:$0xff]  }
   0x2   :  { %v47_v2 = vsel %vm45_vm0, %v33_v0, 0  ;;  %v31_v3 = vld [vmem:[%s619_s0] sm:$0xf]  ;;  %387 = vmatprep.subr.bf16.mxu1 %v472_v1  ;;  %403 = vmatprep.mubr.msk.bf16.mxu1 %vm473_vm2, %v472_v1  ;;  %v433_v8 = vld [vmem:[%s622_s3 + $0x18] sm:$0xff]  }
   0x3   :  { %v430_v4 = vld [vmem:[%s622_s3] sm:$0xff]   ;;  %382 = vmatpush3.bf16.msra.mxu0 %v47_v2  ;;  %v32_v5 = vpack.c.bf16 %v31_v3, %v31_v3 }
   0x4   :  { %388 = vmatpush3.bf16.msra.mxu1 %v430_v4  ;;  %407 = vmatprep.subr.bf16.mxu0 %v472_v1 }
   0x5   :  { %389 = vmatprep.subr.bf16.mxu1 %v472_v1 }
   0x6   :  { %384 = vmatmul.mubr.msk.bf16.vlgmr.msra.gmra.mrb[0].mxu0 %vm41_vm1, %v32_v5 }
   0x7   :  { %423 = vmatprep.mubr.msk.bf16.mxu0 %vm473_vm2, %v472_v1 }
   0x8   :  { %390 = vmatpush3.bf16.msra.mxu1 %v431_v6 }
   0x9   :  { %391 = vmatprep.subr.bf16.mxu1 %v472_v1 }
   0xc   :  { %392 = vmatpush3.bf16.msra.mxu1 %v432_v7 }
   0xd   :  { %393 = vmatprep.subr.bf16.mxu1 %v472_v1 }
   0xe   :  { %13 = vsyncpa [#allocation3], 0  ;;  %v434_v9 = vld [vmem:[%s622_s3 + $0x20] sm:$0xff]   ;;  %v435_v10 = vld [vmem:[%s622_s3 + $0x28] sm:$0xff]   ;;  %s474_s19 = smov [#allocation2]   ;;  %vm324_vm3 = vcmask 27648  }
   0xf   :  { %v436_v11 = vld [vmem:[%s622_s3 + $0x30] sm:$0xff]   ;;  %v437_v12 = vld [vmem:[%s622_s3 + $0x38] sm:$0xff]   ;;  %v438_v13 = vld [vmem:[%s624_s5] sm:$0xff]   ;;  %s332_s20 = sshll.u32 %s474_s19, 4  ;;  %s333_s20 = int_to_ptr.vmem [resolvable:$true] %s332_s20 }
  0x10   :  { %394 = vmatpush3.bf16.msra.mxu1 %v433_v8  ;;  %408 = vmatpush3.bf16.msra.mxu0 %v438_v13  ;;  %v439_v14 = vld [vmem:[%s624_s5 + $0x8] sm:$0xff]   ;;  %v440_v15 = vld [vmem:[%s624_s5 + $0x10] sm:$0xff]   ;;  %v441_v16 = vld [vmem:[%s624_s5 + $0x18] sm:$0xff]   ;;  %s448_s21 = scalar_lea.vmem %s333_s20, 64  ;;  %p453_p1 = scmp.lt.s32.totalorder %s333_s20, %s333_s20 }
  0x11   :  { %395 = vmatprep.subr.bf16.mxu1 %v472_v1  ;;  %409 = vmatprep.subr.bf16.mxu0 %v472_v1  ;;  %v442_v17 = vld [vmem:[%s624_s5 + $0x20] sm:$0xff]   ;;  %v443_v18 = vld [vmem:[%s624_s5 + $0x28] sm:$0xff]   ;;  %v444_v27 = vld [vmem:[%s624_s5 + $0x30] sm:$0xff]   ;;  %p449_p0 = scmp.ne.s32.totalorder %s333_s20, %s448_s21  ;;  %p454_p2 = scmp.lt.s32.totalorder %s448_s21, %s448_s21 }
  0x12   :  { %v340_v19 = vld [vmem:[%s621_s2] ss:$0 sm:$0xff]  ;;  %v445_v28 = vld [vmem:[%s624_s5 + $0x38] sm:$0xff]  }
  0x13   :  { %v342_v29 = vld [vmem:[%s623_s4] ss:$0 sm:$0xff]  ;;  %p455_p3 = por %p454_p2, %p453_p1 }
  0x14   :  { %396 = vmatpush3.bf16.msra.mxu1 %v434_v9  ;;  %410 = vmatpush3.bf16.msra.mxu0 %v439_v14  ;;  %v351_v37 = vld [vmem:[%s625_s6] ss:$0 sm:$0xff] }
  0x15   :  { %397 = vmatprep.subr.bf16.mxu1 %v472_v1  ;;  %411 = vmatprep.subr.bf16.mxu0 %v472_v1  ;;  %v360_v43 = vld [vmem:[%s626_s7] ss:$0 sm:$0xff]  ;;  %p456_p4 = pnand %p455_p3, %p449_p0 }
  0x18   :  { %398 = vmatpush3.bf16.msra.mxu1 %v435_v10  ;;  %412 = vmatpush3.bf16.msra.mxu0 %v440_v15 }
  0x19   :  { %399 = vmatprep.subr.bf16.mxu1 %v472_v1  ;;  %413 = vmatprep.subr.bf16.mxu0 %v472_v1 }
  0x1c   :  { %400 = vmatpush3.bf16.msra.mxu1 %v436_v11  ;;  %414 = vmatpush3.bf16.msra.mxu0 %v441_v16 }
  0x1d   :  { %401 = vmatprep.subr.bf16.mxu1 %v472_v1  ;;  %415 = vmatprep.subr.bf16.mxu0 %v472_v1 }
  0x20   :  { %402 = vmatpush3.bf16.msra.mxu1 %v437_v12  ;;  %416 = vmatpush3.bf16.msra.mxu0 %v442_v17 }
  0x21   :  { %417 = vmatprep.subr.bf16.mxu0 %v472_v1 }
  0x24   :  { %418 = vmatpush3.bf16.msra.mxu0 %v443_v18 }
  0x25   :  { %419 = vmatprep.subr.bf16.mxu0 %v472_v1 }
  0x28   :  { %420 = vmatpush3.bf16.msra.mxu0 %v444_v27 }
  0x29   :  { %421 = vmatprep.subr.bf16.mxu0 %v472_v1 }
  0x2c   :  { %422 = vmatpush3.bf16.msra.mxu0 %v445_v28 }
  0xd9   :  { %v83_v20 = vpop.f32.mrb[0].mxu0 }
  0xda   :  { %v84_v21 = vadd.f32 %v340_v19, %v83_v20  ;;  %v385_v22 = vpop.f32.mrb[1].mxu0 }
  0xdb   :  { %v86_v23 = vpop.f32.mrb[2].mxu0 }
  0xdc   :  { %v89_v24 = vmax.f32 %v84_v21, 0.0  ;;  %v386_v25 = vpop.f32.mrb[3].mxu0 }
  0xde   :  { %v90_v26 = vpack.c.bf16 %v89_v24, %v89_v24 }
  0xe0   :  { %404 = vmatmul.mubr.bf16.vlgmr.msra.gmra.mrb[0].mxu1 %v90_v26 }
 0x1b3   :  { %v196_v30 = vpop.f32.mrb[0].mxu1 }
 0x1b4   :  { %v197_v31 = vadd.f32 %v342_v29, %v196_v30  ;;  %v405_v32 = vpop.f32.mrb[1].mxu1 }
 0x1b5   :  { %v199_v33 = vpop.f32.mrb[2].mxu1 }
 0x1b6   :  { %v202_v34 = vmax.f32 %v197_v31, 0.0  ;;  %v406_v35 = vpop.f32.mrb[3].mxu1 }
 0x1b8   :  { %v203_v36 = vpack.c.bf16 %v202_v34, %v202_v34 }
 0x1ba   :  { %424 = vmatmul.mubr.bf16.vlgmr.msra.gmra.mrb[4].mxu0 %v203_v36 }
 0x28d   :  { %v309_v38 = vpop.f32.mrb[4].mxu0 }
 0x28e   :  { %v310_v39 = vadd.f32 %v351_v37, %v309_v38  ;;  %v425_v40 = vpop.f32.mrb[5].mxu0 }
 0x28f   :  { %v312_v41 = vpop.f32.mrb[6].mxu0 }
 0x290   :  { %446 = vtanh.f32 %v310_v39  ;;  %v426_v42 = vpop.f32.mrb[7].mxu0 }
 0x29a   :  { %v447_v44 = vpop.eup %446 }
 0x29b   :  { %v323_v45 = vmul.f32 %v447_v44, %v360_v43 }
 0x29d   :  { %325 = vst.msk [vmem:[#allocation2] sm:$0xf] %vm324_vm3, %v323_v45 }
 0x29e   :  { %459 = shalt.err (!%p456_p4)
}
 0x29f   :  { %s460_s23 = scalar_lea.hbm %s627_s8, 64 }
 0x2a0   :  { %p461_p5 = scmp.ne.s32.totalorder %s627_s8, %s460_s23  ;;  %p464_p6 = scmp.lt.u32.totalorder %s460_s23, %s627_s8 }
 0x2a2   :  { %p466_p7 = pnand %p464_p6, %p461_p5 }
 0x2a4   :  { %469 = shalt.err (!%p466_p7)
}
 0x2a5   :  { %335 = dma.vmem_to_hbm [thread:$0]  %s333_s20, 64, %s627_s8, [#allocation3]  }
 0x2a6   :  { %470 = dma.done.wait [#allocation3], 64  }
 0x2a7   :  { %471 = vsyncadd [#allocation3], 4294967232 }
 0x2a8   :  { %339 = vsyncpa [#allocation3], 1 }

</bundles_post_ra>
